<compile_context>
chip_gen: v6e
topology: v6e:2x2x1
jax: 0.10.0
libtpu: 0.0.40
codegen_flags: <defaults>
</compile_context>

<pallas_src>
import functools

import jax
import jax.numpy as jnp
from jax.experimental import pallas as pl
from jax.experimental.pallas import tpu as pltpu


def _round_up(n: int, m: int) -> int:
    return ((n + m - 1) // m) * m


def _gap1d_kernel(x_ref, o_ref, acc_ref, *, t_total, t_tile, k_half, last_k,
                  needs_mask):
    """x_ref: (Bt, Tt, Ct) tile; o_ref: (1, Bt, Ct); acc_ref: (Bt, Ct) f32."""
    p = pl.program_id(0)   # time-split (megacore) axis
    k = pl.program_id(3)   # reduction (time) step within this split

    @pl.when(k == 0)
    def _init():
        acc_ref[...] = jnp.zeros_like(acc_ref)

    if needs_mask:
        # Only the globally-last time block is partial; every other step takes
        # the cheap cast+add path.
        t_start = (p * k_half + k) * t_tile
        is_full = t_start + t_tile <= t_total

        @pl.when(is_full)
        def _acc_full():
            acc_ref[...] += jnp.sum(x_ref[...].astype(jnp.float32), axis=1)

        @pl.when(jnp.logical_not(is_full))
        def _acc_masked():
            ct = x_ref.shape[2]
            t_ids = jax.lax.broadcasted_iota(jnp.int32, (t_tile, ct), 0)
            valid = (t_start + t_ids) < t_total            # (Tt, Ct)
            x = jnp.where(valid[None, :, :],
                          x_ref[...].astype(jnp.float32), 0.0)
            acc_ref[...] += jnp.sum(x, axis=1)
    else:
        acc_ref[...] += jnp.sum(x_ref[...].astype(jnp.float32), axis=1)

    @pl.when(k == last_k)
    def _finalize():
        # Divisor is the LOGICAL time length, never the block's T.
        o_ref[0] = (acc_ref[...] * jnp.float32(1.0 / t_total)).astype(o_ref.dtype)


def global_avg_pool_1d(x: jax.Array, *,
                       tile_budget_bytes: int = 8 * 1024 * 1024,
                       min_pallas_bytes: int = 512 * 1024) -> jax.Array:
    """(batch, time, channels) -> (batch, channels), mean over time."""
    B, T, C = x.shape
    orig_dtype = x.dtype
    itemsize = x.dtype.itemsize

    # Tiny inputs: a Pallas launch costs more than the whole op; use an
    # f32-accumulated mean for numerical parity with the kernel path.
    if T <= 1 or x.size * itemsize <= min_pallas_bytes:
        return jnp.mean(x.astype(jnp.float32), axis=1).astype(orig_dtype)

    # ---- Tile selection ------------------------------------------------------
    # Batch rows: full B when small, otherwise whole sublane groups of 8.
    Bt = B if B <= 8 else 8

    # Channels map to lanes: full-C when C is not a clean multiple of 128
    # (full-dim blocks are legal and keep the output store lane-dense).
    if C % 128 == 0:
        Ct = min(C, 1024)
    elif C <= 1024:
        Ct = C
    else:
        Ct = min((C // 128) * 128, 1024)

    gb = pl.cdiv(B, Bt)
    gc = pl.cdiv(C, Ct)

    # Time maps to sublanes.  Prefer a single full-T block whenever it fits the
    # dtype-aware tile budget; otherwise use a multiple-of-8 Tt rebalanced to
    # minimize last-block padding.
    row_bytes = Bt * Ct * itemsize
    max_t = max(8, tile_budget_bytes // row_bytes)

    if T <= max_t:
        Tt = T
    else:
        Tt0 = max(8, (max_t // 8) * 8)
        n = pl.cdiv(T, Tt0)
        if gb * gc == 1 and n % 2 == 1:
            n += 1  # keep the reduction splittable across 2 TensorCores (v7x)
        Tt = min(Tt0, _round_up(pl.cdiv(T, n), 8))
    gk = pl.cdiv(T, Tt)

    # Megacore split of the time reduction when there is only one (Bt, Ct)
    # tile: leading parallel axis of size 2, f32 partial sums combined in XLA.
    if gb * gc == 1 and gk >= 2 and gk % 2 == 0:
        P, k_half = 2, gk // 2
    else:
        P, k_half = 1, gk

    needs_mask = (T % Tt) != 0
    out_dtype = orig_dtype if P == 1 else jnp.float32

    kernel = functools.partial(
        _gap1d_kernel,
        t_total=T, t_tile=Tt, k_half=k_half, last_k=k_half - 1,
        needs_mask=needs_mask,
    )

    partials = pl.pallas_call(
        kernel,
        out_shape=jax.ShapeDtypeStruct((P, B, C), out_dtype),
        grid_spec=pltpu.PrefetchScalarGridSpec(
            num_scalar_prefetch=0,
            grid=(P, gb, gc, k_half),  # reduction axis last
            in_specs=[pl.BlockSpec((Bt, Tt, Ct),
                                   lambda p, b, c, k: (b, p * k_half + k, c))],
            out_specs=pl.BlockSpec((1, Bt, Ct),
                                   lambda p, b, c, k: (p, b, c)),
            scratch_shapes=[pltpu.VMEM((Bt, Ct), jnp.float32)],
        ),
        compiler_params=pltpu.CompilerParams(
            dimension_semantics=("parallel", "parallel", "parallel", "arbitrary"),
            # 32 MiB scoped VMEM: fits double-buffered ~8 MiB tiles and is safe
            # on v5e/v6e (128 MiB physical) and v7x (64 MiB physical).
            vmem_limit_bytes=32 * 1024 * 1024,
        ),
    )(x)

    if P == 1:
        return partials[0]
    # Combine the two per-core partial means (already divided by the true T).
    return jnp.sum(partials, axis=0).astype(orig_dtype)


if __name__ == "__main__":
    key = jax.random.PRNGKey(0)
    k1, k2, k3, k4, k5 = jax.random.split(key, 5)

    def ref(v):
        return jnp.mean(v.astype(jnp.float32), axis=1).astype(v.dtype)

    # Case 1: tiny module-docstring shape -> wrapper dispatches to jnp.mean.
    x1 = jax.random.normal(k1, (2, 8, 32), dtype=jnp.float32)
    o1 = jax.block_until_ready(global_avg_pool_1d(x1))
    assert o1.shape == (2, 32), o1.shape
    assert jnp.allclose(o1, ref(x1), atol=1e-5, rtol=1e-5), "tiny-path mismatch"

    # Case 2: f32, single full-T block Pallas path (no mask, one reduction step).
    x2 = jax.random.normal(k2, (8, 100, 256), dtype=jnp.float32)
    o2 = jax.block_until_ready(global_avg_pool_1d(x2))
    assert o2.shape == (8, 256), o2.shape
    assert jnp.allclose(o2, ref(x2), atol=1e-5, rtol=1e-5), "f32 kernel mismatch"

    # Case 3: bf16, full-T block with f32 accumulation.
    x3 = jax.random.normal(k3, (4, 600, 256), dtype=jnp.bfloat16)
    o3 = jax.block_until_ready(global_avg_pool_1d(x3))
    assert o3.shape == (4, 256), o3.shape
    assert jnp.allclose(o3.astype(jnp.float32), ref(x3).astype(jnp.float32),
                        atol=2e-2, rtol=2e-2), "bf16 kernel mismatch"

    # Case 4: multi-step reduction + ragged tail mask + 2-way time split
    # (small tile budget forces the tiled path on a small array).
    x4 = jax.random.normal(k4, (2, 200, 128), dtype=jnp.float32)
    o4 = jax.block_until_ready(
        global_avg_pool_1d(x4, tile_budget_bytes=64 * 1024, min_pallas_bytes=0))
    assert o4.shape == (2, 128), o4.shape
    assert jnp.allclose(o4, ref(x4), atol=1e-5, rtol=1e-5), "split kernel mismatch"

    # Case 5: multi-step reduction with multiple batch blocks (no mask, no split).
    x5 = jax.random.normal(k5, (16, 64, 256), dtype=jnp.float32)
    o5 = jax.block_until_ready(
        global_avg_pool_1d(x5, tile_budget_bytes=128 * 1024, min_pallas_bytes=0))
    assert o5.shape == (16, 256), o5.shape
    assert jnp.allclose(o5, ref(x5), atol=1e-5, rtol=1e-5), "tiled kernel mismatch"

    print("KERNEL_OK")
</pallas_src>

<mosaic_0001>
module attributes {stable_mosaic.version = 11 : i64} {
  func.func @_gap1d_kernel(%arg0: i32, %arg1: i32, %arg2: i32, %arg3: i32, %arg4: memref<8x100x256xf32, #tpu.memory_space<vmem>>, %arg5: memref<1x8x256xf32, #tpu.memory_space<vmem>>, %arg6: memref<8x256xf32, #tpu.memory_space<vmem>>) attributes {dimension_semantics = [#tpu.dimension_semantics<parallel>, #tpu.dimension_semantics<parallel>, #tpu.dimension_semantics<parallel>, #tpu.dimension_semantics<arbitrary>], iteration_bounds = array<i64: 1, 1, 1, 1>, scalar_prefetch = 0 : i64, scratch_operands = 1 : i64, tpu.core_type = #tpu.core_type<tc>, window_params = [{transform_indices = @transform_0, window_bounds = array<i64: 8, 100, 256>}, {transform_indices = @transform_1, window_bounds = array<i64: 1, 8, 256>}]} {
    %c0_i32 = arith.constant 0 : i32
    %0 = arith.cmpi eq, %arg3, %c0_i32 : i32
    %1 = arith.extui %0 : i1 to i32
    %c0_i32_0 = arith.constant 0 : i32
    %2 = arith.cmpi ne, %1, %c0_i32_0 : i32
    scf.if %2 {
      %cst_9 = arith.constant 0.000000e+00 : f32
      %11 = vector.broadcast %cst_9 : f32 to vector<8x256xf32>
      %c0_10 = arith.constant 0 : index
      %c0_11 = arith.constant 0 : index
      %12 = vector.load %arg6[%c0_10, %c0_11] : memref<8x256xf32, #tpu.memory_space<vmem>>, vector<8x256xf32>
      tpu.vector_store %arg6[%c0_10, %c0_11], %11 {strides = array<i32>} : memref<8x256xf32, #tpu.memory_space<vmem>>, vector<8x256xf32>,
    } else {
    }
    %c0 = arith.constant 0 : index
    %c0_1 = arith.constant 0 : index
    %3 = vector.load %arg6[%c0, %c0_1] : memref<8x256xf32, #tpu.memory_space<vmem>>, vector<8x256xf32>
    %c0_2 = arith.constant 0 : index
    %c0_3 = arith.constant 0 : index
    %c0_4 = arith.constant 0 : index
    %4 = vector.load %arg4[%c0_2, %c0_3, %c0_4] : memref<8x100x256xf32, #tpu.memory_space<vmem>>, vector<8x100x256xf32>
    %cst = arith.constant dense<0.000000e+00> : vector<8x256xf32>
    %5 = vector.multi_reduction <add>, %4, %cst [1] : vector<8x100x256xf32> to vector<8x256xf32>
    %6 = arith.addf %3, %5 : vector<8x256xf32>
    %c0_5 = arith.constant 0 : index
    %c0_6 = arith.constant 0 : index
    %7 = vector.load %arg6[%c0_5, %c0_6] : memref<8x256xf32, #tpu.memory_space<vmem>>, vector<8x256xf32>
    tpu.vector_store %arg6[%c0_5, %c0_6], %6 {strides = array<i32>} : memref<8x256xf32, #tpu.memory_space<vmem>>, vector<8x256xf32>,
    %c0_i32_7 = arith.constant 0 : i32
    %8 = arith.cmpi eq, %arg3, %c0_i32_7 : i32
    %9 = arith.extui %8 : i1 to i32
    %c0_i32_8 = arith.constant 0 : i32
    %10 = arith.cmpi ne, %9, %c0_i32_8 : i32
    scf.if %10 {
      %c0_9 = arith.constant 0 : index
      %c0_10 = arith.constant 0 : index
      %11 = vector.load %arg6[%c0_9, %c0_10] : memref<8x256xf32, #tpu.memory_space<vmem>>, vector<8x256xf32>
      %cst_11 = arith.constant 0.00999999977 : f32
      %12 = vector.broadcast %cst_11 : f32 to vector<8x256xf32>
      %13 = arith.mulf %11, %12 : vector<8x256xf32>
      %c0_12 = arith.constant 0 : index
      %c0_13 = arith.constant 0 : index
      %c0_14 = arith.constant 0 : index
      %14 = vector.load %arg5[%c0_12, %c0_13, %c0_14] : memref<1x8x256xf32, #tpu.memory_space<vmem>>, vector<1x8x256xf32>
      %15 = vector.shape_cast %14 : vector<1x8x256xf32> to vector<8x256xf32>
      %16 = vector.shape_cast %13 : vector<8x256xf32> to vector<1x8x256xf32>
      tpu.vector_store %arg5[%c0_12, %c0_13, %c0_14], %16 {strides = array<i32>} : memref<1x8x256xf32, #tpu.memory_space<vmem>>, vector<1x8x256xf32>,
    } else {
    }
    return
  }
  func.func @transform_0(%arg0: i32, %arg1: i32, %arg2: i32, %arg3: i32) -> (i32, i32, i32) {
    %c1_i32 = arith.constant 1 : i32
    %0 = arith.muli %arg0, %c1_i32 : i32
    %1 = arith.addi %0, %arg3 : i32
    %c0_i32 = arith.constant 0 : i32
    return %arg1, %1, %arg2 : i32, i32, i32
  }
  func.func @transform_1(%arg0: i32, %arg1: i32, %arg2: i32, %arg3: i32) -> (i32, i32, i32) {
    %c0_i32 = arith.constant 0 : i32
    return %arg0, %arg1, %arg2 : i32, i32, i32
  }
}

</mosaic_0001>

<bundles_post_ra>
// kernel: tpu_custom_call.1
= control target key start
LH: loop header
LB: loop body
LE: loop exit
PB: predicated region body
PF: predicated region fallthrough
CT: control target
= control target key end

     0   :  { %6 = vsyncpa [#allocation4], 0  ;;  %vm261_vm0 = vcmask 1043456   ;;  %vm571_vm1 = vcmask 1041409   ;;  %vm573_vm2 = vcmask 1042434   ;;  %vm575_vm3 = vcmask 1043459   ;;  %s1351_s0 = inlined_call_operand.vmem [shape: f32[8,100,256], index: 0, kind: input, shape index: {}]   ;;  %s1352_s1 = inlined_call_operand.hbm [shape: f32[1,8,256], index: 1, kind: output, shape index: {}]  }
   0x1   :  { %v42_v0 = vld [vmem:[%s1351_s0] sm:$0xff]  ;;  %v43_v1 = vld [vmem:[%s1351_s0 + $0x8] sm:$0xff]  ;;  %v44_v2 = vld [vmem:[%s1351_s0 + $0x10] sm:$0xff]  ;;  %vm577_vm4 = vcmask 1044484   ;;  %vm579_vm5 = vcmask 1045509   ;;  %vm581_vm6 = vcmask 1046534  }
   0x2   :  { %v45_v3 = vld [vmem:[%s1351_s0 + $0x18] sm:$0xff]  ;;  %v46_v4 = vld [vmem:[%s1351_s0 + $0x20] sm:$0xff]  ;;  %v47_v5 = vld [vmem:[%s1351_s0 + $0x28] sm:$0xff]  ;;  %v250_v6 = vadd.f32 %v44_v2, %v42_v0  ;;  %vm583_vm7 = vcmask 1047559  }
   0x3   :  { %v270_v7 = vadd.f32 %v45_v3, %v43_v1  ;;  %v48_v8 = vld [vmem:[%s1351_s0 + $0x30] sm:$0xff]  ;;  %v49_v9 = vld [vmem:[%s1351_s0 + $0x38] sm:$0xff]  ;;  %v50_v12 = vld [vmem:[%s1351_s0 + $0x40] sm:$0xff] }
   0x4   :  { %v251_v10 = vadd.f32 %v250_v6, %v46_v4  ;;  %v51_v13 = vld [vmem:[%s1351_s0 + $0x48] sm:$0xff]  ;;  %v52_v16 = vld [vmem:[%s1351_s0 + $0x50] sm:$0xff]  ;;  %v53_v17 = vld [vmem:[%s1351_s0 + $0x58] sm:$0xff] }
   0x5   :  { %v271_v11 = vadd.f32 %v270_v7, %v47_v5  ;;  %v54_v18 = vld [vmem:[%s1351_s0 + $0x60] sm:$0xff]  ;;  %v55_v19 = vld [vmem:[%s1351_s0 + $0x68] sm:$0xff]  ;;  %v68_v22 = vld [vmem:[%s1351_s0 + $0xd0] sm:$0xff] }
   0x6   :  { %v252_v14 = vadd.f32 %v251_v10, %v48_v8  ;;  %v69_v23 = vld [vmem:[%s1351_s0 + $0xd8] sm:$0xff]  ;;  %v70_v24 = vld [vmem:[%s1351_s0 + $0xe0] sm:$0xff]  ;;  %v71_v25 = vld [vmem:[%s1351_s0 + $0xe8] sm:$0xff] }
   0x7   :  { %v272_v15 = vadd.f32 %v271_v11, %v49_v9  ;;  %v72_v26 = vld [vmem:[%s1351_s0 + $0xf0] sm:$0xff]  ;;  %v73_v27 = vld [vmem:[%s1351_s0 + $0xf8] sm:$0xff]  ;;  %v289_v30 = vadd.f32 %v70_v24, %v68_v22  ;;  %v74_v33 = vld [vmem:[%s1351_s0 + $0x100] sm:$0xff]  ;;  %v308_v34 = vadd.f32 %v71_v25, %v69_v23 }
   0x8   :  { %v253_v20 = vadd.f32 %v252_v14, %v50_v12  ;;  %v56_v31 = vld [vmem:[%s1351_s0 + $0x70] sm:$0xff]  ;;  %v57_v32 = vld [vmem:[%s1351_s0 + $0x78] sm:$0xff]  ;;  %v75_v35 = vld [vmem:[%s1351_s0 + $0x108] sm:$0xff] }
   0x9   :  { %v273_v21 = vadd.f32 %v272_v15, %v51_v13  ;;  %v290_v38 = vadd.f32 %v289_v30, %v72_v26  ;;  %v58_v39 = vld [vmem:[%s1351_s0 + $0x80] sm:$0xff]  ;;  %v59_v40 = vld [vmem:[%s1351_s0 + $0x88] sm:$0xff]  ;;  %v76_v41 = vld [vmem:[%s1351_s0 + $0x110] sm:$0xff]  ;;  %v309_v42 = vadd.f32 %v308_v34, %v73_v27 }
   0xa   :  { %v254_v28 = vadd.f32 %v253_v20, %v52_v16  ;;  %v77_v43 = vld [vmem:[%s1351_s0 + $0x118] sm:$0xff]  ;;  %v60_v47 = vld [vmem:[%s1351_s0 + $0x90] sm:$0xff]  ;;  %v78_v49 = vld [vmem:[%s1351_s0 + $0x120] sm:$0xff] }
   0xb   :  { %v274_v29 = vadd.f32 %v273_v21, %v53_v17  ;;  %v291_v46 = vadd.f32 %v290_v38, %v74_v33  ;;  %v61_v48 = vld [vmem:[%s1351_s0 + $0x98] sm:$0xff]  ;;  %v310_v50 = vadd.f32 %v309_v42, %v75_v35  ;;  %v62_v51 = vld [vmem:[%s1351_s0 + $0xa0] sm:$0xff]  ;;  %v79_v52 = vld [vmem:[%s1351_s0 + $0x128] sm:$0xff] }
   0xc   :  { %v255_v36 = vadd.f32 %v254_v28, %v54_v18  ;;  %v63_v56 = vld [vmem:[%s1351_s0 + $0xa8] sm:$0xff]  ;;  %v64_v57 = vld [vmem:[%s1351_s0 + $0xb0] sm:$0xff]  ;;  %v81_v59 = vld [vmem:[%s1351_s0 + $0x138] sm:$0xff] }
   0xd   :  { %v275_v37 = vadd.f32 %v274_v29, %v55_v19  ;;  %v292_v55 = vadd.f32 %v291_v46, %v76_v41  ;;  %v80_v58 = vld [vmem:[%s1351_s0 + $0x130] sm:$0xff]  ;;  %v94_v60 = vld [vmem:[%s1351_s0 + $0x1a0] sm:$0xff]  ;;  %v311_v61 = vadd.f32 %v310_v50, %v77_v43  ;;  %v95_v63 = vld [vmem:[%s1351_s0 + $0x1a8] sm:$0xff] }
   0xe   :  { %v256_v44 = vadd.f32 %v255_v36, %v56_v31  ;;  %v66_v62 = vld [vmem:[%s1351_s0 + $0xc0] sm:$0xf]  ;;  %v96_v0 = vld [vmem:[%s1351_s0 + $0x1b0] sm:$0xff]  ;;  %v97_v1 = vld [vmem:[%s1351_s0 + $0x1b8] sm:$0xff] }
   0xf   :  { %v276_v45 = vadd.f32 %v275_v37, %v57_v32  ;;  %v293_v4 = vadd.f32 %v292_v55, %v78_v49  ;;  %v82_v5 = vld [vmem:[%s1351_s0 + $0x140] sm:$0xff]  ;;  %v99_v7 = vld [vmem:[%s1351_s0 + $0x1c8] sm:$0xff]  ;;  %v312_v8 = vadd.f32 %v311_v61, %v79_v52  ;;  %v327_v9 = vadd.f32 %v96_v0, %v94_v60  ;;  %v100_v12 = vld [vmem:[%s1351_s0 + $0x1d0] sm:$0xff] }
  0x10   :  { %v257_v53 = vadd.f32 %v256_v44, %v58_v39  ;;  %v98_v6 = vld [vmem:[%s1351_s0 + $0x1c0] sm:$0xff]  ;;  %v346_v10 = vadd.f32 %v97_v1, %v95_v63  ;;  %v83_v11 = vld [vmem:[%s1351_s0 + $0x148] sm:$0xff]  ;;  %v101_v13 = vld [vmem:[%s1351_s0 + $0x1d8] sm:$0xff]  ;;  %v262_v29 = vsel %vm261_vm0, %v66_v62, 0.0 }
  0x11   :  { %v277_v54 = vadd.f32 %v276_v45, %v59_v40  ;;  %v294_v15 = vadd.f32 %v293_v4, %v80_v58  ;;  %v84_v16 = vld [vmem:[%s1351_s0 + $0x150] sm:$0xff]  ;;  %v313_v17 = vadd.f32 %v312_v8, %v81_v59  ;;  %v328_v18 = vadd.f32 %v327_v9, %v98_v6  ;;  %v85_v20 = vld [vmem:[%s1351_s0 + $0x158] sm:$0xff]  ;;  %v102_v21 = vld [vmem:[%s1351_s0 + $0x1e0] sm:$0xff] }
  0x12   :  { %v258_v2 = vadd.f32 %v257_v53, %v60_v47  ;;  %v347_v19 = vadd.f32 %v346_v10, %v99_v7  ;;  %v103_v22 = vld [vmem:[%s1351_s0 + $0x1e8] sm:$0xff]  ;;  %v65_v26 = vld [vmem:[%s1351_s0 + $0xb8] sm:$0xff]  ;;  %v86_v28 = vld [vmem:[%s1351_s0 + $0x160] sm:$0xff] }
  0x13   :  { %v278_v3 = vadd.f32 %v277_v54, %v61_v48  ;;  %v295_v25 = vadd.f32 %v294_v15, %v82_v5  ;;  %v67_v27 = vld [vmem:[%s1351_s0 + $0xc8] sm:$0xf]  ;;  %v314_v30 = vadd.f32 %v313_v17, %v83_v11  ;;  %v329_v31 = vadd.f32 %v328_v18, %v100_v12  ;;  %v104_v34 = vld [vmem:[%s1351_s0 + $0x1f0] sm:$0xff]  ;;  %v105_v35 = vld [vmem:[%s1351_s0 + $0x1f8] sm:$0xff] }
  0x14   :  { %v259_v14 = vadd.f32 %v258_v2, %v62_v51  ;;  %v348_v32 = vadd.f32 %v347_v19, %v101_v13  ;;  %v87_v33 = vld [vmem:[%s1351_s0 + $0x168] sm:$0xff]  ;;  %v88_v37 = vld [vmem:[%s1351_s0 + $0x170] sm:$0xff]  ;;  %v89_v41 = vld [vmem:[%s1351_s0 + $0x178] sm:$0xff]  ;;  %v281_v51 = vsel %vm261_vm0, %v67_v27, 0.0 }
  0x15   :  { %v279_v24 = vadd.f32 %v278_v3, %v63_v56  ;;  %v296_v36 = vadd.f32 %v295_v25, %v84_v16  ;;  %v315_v38 = vadd.f32 %v314_v30, %v85_v20  ;;  %v330_v39 = vadd.f32 %v329_v31, %v102_v21  ;;  %v106_v42 = vld [vmem:[%s1351_s0 + $0x200] sm:$0xff]  ;;  %v107_v43 = vld [vmem:[%s1351_s0 + $0x208] sm:$0xff]  ;;  %v120_v44 = vld [vmem:[%s1351_s0 + $0x270] sm:$0xff] }
  0x16   :  { %v260_v23 = vadd.f32 %v259_v14, %v64_v57  ;;  %v349_v40 = vadd.f32 %v348_v32, %v103_v22  ;;  %v121_v48 = vld [vmem:[%s1351_s0 + $0x278] sm:$0xff]  ;;  %v122_v49 = vld [vmem:[%s1351_s0 + $0x280] sm:$0xff]  ;;  %v123_v50 = vld [vmem:[%s1351_s0 + $0x288] sm:$0xff] }
  0x17   :  { %v280_v46 = vadd.f32 %v279_v24, %v65_v26  ;;  %v297_v47 = vadd.f32 %v296_v36, %v86_v28  ;;  %v316_v52 = vadd.f32 %v315_v38, %v87_v33  ;;  %v331_v53 = vadd.f32 %v330_v39, %v104_v34  ;;  %v90_v55 = vld [vmem:[%s1351_s0 + $0x180] sm:$0xff]  ;;  %v108_v56 = vld [vmem:[%s1351_s0 + $0x210] sm:$0xff]  ;;  %v109_v60 = vld [vmem:[%s1351_s0 + $0x218] sm:$0xff] }
  0x18   :  { %v263_v45 = vadd.f32 %v262_v29, %v260_v23  ;;  %v350_v54 = vadd.f32 %v349_v40, %v105_v35  ;;  %v124_v57 = vld [vmem:[%s1351_s0 + $0x290] sm:$0xff]  ;;  %v125_v61 = vld [vmem:[%s1351_s0 + $0x298] sm:$0xff]  ;;  %v365_v0 = vadd.f32 %v122_v49, %v120_v44  ;;  %v110_v1 = vld [vmem:[%s1351_s0 + $0x220] sm:$0xff]  ;;  %v384_v5 = vadd.f32 %v123_v50, %v121_v48 }
  0x19   :  { %v298_v58 = vadd.f32 %v297_v47, %v88_v37  ;;  %v92_v59 = vld [vmem:[%s1351_s0 + $0x190] sm:$0xf]  ;;  %v332_v62 = vadd.f32 %v331_v53, %v106_v42  ;;  %v126_v2 = vld [vmem:[%s1351_s0 + $0x2a0] sm:$0xff]  ;;  %v282_v4 = vadd.f32 %v281_v51, %v280_v46  ;;  %v127_v6 = vld [vmem:[%s1351_s0 + $0x2a8] sm:$0xff]  ;;  %v317_v8 = vadd.f32 %v316_v52, %v89_v41 }
  0x1a   :  { %v351_v63 = vadd.f32 %v350_v54, %v107_v43  ;;  %v264_v3 = vrot.slane %v263_v45, 4  ;;  %v366_v10 = vadd.f32 %v365_v0, %v124_v57  ;;  %v91_v11 = vld [vmem:[%s1351_s0 + $0x188] sm:$0xff]  ;;  %v300_v12 = vsel %vm261_vm0, %v92_v59, 0.0  ;;  %v93_v15 = vld [vmem:[%s1351_s0 + $0x198] sm:$0xf]  ;;  %v128_v17 = vld [vmem:[%s1351_s0 + $0x2b0] sm:$0xff] }
  0x1b   :  { %v299_v7 = vadd.f32 %v298_v58, %v90_v55  ;;  %v333_v9 = vadd.f32 %v332_v62, %v108_v56  ;;  %v385_v14 = vadd.f32 %v384_v5, %v125_v61  ;;  %v111_v16 = vld [vmem:[%s1351_s0 + $0x228] sm:$0xff]  ;;  %v112_v20 = vld [vmem:[%s1351_s0 + $0x230] sm:$0xff]  ;;  %v283_v22 = vrot.slane %v282_v4, 4  ;;  %v113_v24 = vld [vmem:[%s1351_s0 + $0x238] sm:$0xff] }
  0x1c   :  { %v352_v13 = vadd.f32 %v351_v63, %v109_v60  ;;  %v367_v19 = vadd.f32 %v366_v10, %v126_v2  ;;  %v265_v21 = vadd.f32 %v264_v3, %v263_v45  ;;  %v129_v25 = vld [vmem:[%s1351_s0 + $0x2b8] sm:$0xff]  ;;  %v130_v26 = vld [vmem:[%s1351_s0 + $0x2c0] sm:$0xff]  ;;  %v318_v28 = vadd.f32 %v317_v8, %v91_v11  ;;  %v131_v29 = vld [vmem:[%s1351_s0 + $0x2c8] sm:$0xff] }
  0x1d   :  { %v334_v18 = vadd.f32 %v333_v9, %v110_v1  ;;  %v386_v23 = vadd.f32 %v385_v14, %v127_v6  ;;  %v301_v27 = vadd.f32 %v300_v12, %v299_v7  ;;  %v146_v30 = vld [vmem:[%s1351_s0 + $0x340] sm:$0xff]  ;;  %v148_v31 = vld [vmem:[%s1351_s0 + $0x350] sm:$0xff]  ;;  %v319_v32 = vsel %vm261_vm0, %v93_v15, 0.0  ;;  %v147_v36 = vld [vmem:[%s1351_s0 + $0x348] sm:$0xff] }
  0x1e   :  { %v353_v33 = vadd.f32 %v352_v13, %v111_v16  ;;  %v368_v34 = vadd.f32 %v367_v19, %v128_v17  ;;  %v132_v35 = vld [vmem:[%s1351_s0 + $0x2d0] sm:$0xff]  ;;  %v149_v37 = vld [vmem:[%s1351_s0 + $0x358] sm:$0xff]  ;;  %v114_v39 = vld [vmem:[%s1351_s0 + $0x240] sm:$0xff]  ;;  %v266_v41 = vrot.slane %v265_v21, 2  ;;  %v284_v42 = vadd.f32 %v283_v22, %v282_v4 }
  0x1f   :  { %v335_v38 = vadd.f32 %v334_v18, %v112_v20  ;;  %v150_v40 = vld [vmem:[%s1351_s0 + $0x360] sm:$0xff]  ;;  %v387_v44 = vadd.f32 %v386_v23, %v129_v25  ;;  %v302_v46 = vrot.slane %v301_v27, 4  ;;  %v320_v47 = vadd.f32 %v319_v32, %v318_v28  ;;  %v133_v49 = vld [vmem:[%s1351_s0 + $0x2d8] sm:$0xff]  ;;  %v151_v50 = vld [vmem:[%s1351_s0 + $0x368] sm:$0xff] }
  0x20   :  { %v369_v43 = vadd.f32 %v368_v34, %v130_v26  ;;  %v134_v45 = vld [vmem:[%s1351_s0 + $0x2e0] sm:$0xff]  ;;  %v403_v48 = vadd.f32 %v148_v31, %v146_v30  ;;  %v152_v51 = vld [vmem:[%s1351_s0 + $0x370] sm:$0xff]  ;;  %v354_v52 = vadd.f32 %v353_v33, %v113_v24  ;;  %v422_v55 = vadd.f32 %v149_v37, %v147_v36  ;;  %v115_v56 = vld [vmem:[%s1351_s0 + $0x248] sm:$0xff] }
  0x21   :  { %v388_v54 = vadd.f32 %v387_v44, %v131_v29  ;;  %v336_v57 = vadd.f32 %v335_v38, %v114_v39  ;;  %v116_v59 = vld [vmem:[%s1351_s0 + $0x250] sm:$0xff]  ;;  %v154_v60 = vld [vmem:[%s1351_s0 + $0x380] sm:$0xff]  ;;  %v267_v61 = vadd.f32 %v266_v41, %v265_v21  ;;  %v285_v62 = vrot.slane %v284_v42, 2  ;;  %v117_v0 = vld [vmem:[%s1351_s0 + $0x258] sm:$0xff] }
  0x22   :  { %v370_v53 = vadd.f32 %v369_v43, %v132_v35  ;;  %v404_v58 = vadd.f32 %v403_v48, %v150_v40  ;;  %v118_v1 = vld [vmem:[%s1351_s0 + $0x260] sm:$0xf]  ;;  %v119_v2 = vld [vmem:[%s1351_s0 + $0x268] sm:$0xf]  ;;  %v136_v3 = vld [vmem:[%s1351_s0 + $0x2f0] sm:$0xff]  ;;  %v423_v6 = vadd.f32 %v422_v55, %v151_v50  ;;  %v303_v10 = vadd.f32 %v302_v46, %v301_v27 }
  0x23   :  { %v389_v4 = vadd.f32 %v388_v54, %v133_v49  ;;  %v135_v7 = vld [vmem:[%s1351_s0 + $0x2e8] sm:$0xff]  ;;  %v153_v8 = vld [vmem:[%s1351_s0 + $0x378] sm:$0xff]  ;;  %v156_v9 = vld [vmem:[%s1351_s0 + $0x390] sm:$0xff]  ;;  %v321_v11 = vrot.slane %v320_v47, 4  ;;  %v355_v12 = vadd.f32 %v354_v52, %v115_v56  ;;  %v337_v16 = vadd.f32 %v336_v57, %v116_v59 }
  0x24   :  { %v371_v63 = vadd.f32 %v370_v53, %v134_v45  ;;  %v405_v5 = vadd.f32 %v404_v58, %v152_v51  ;;  %v155_v13 = vld [vmem:[%s1351_s0 + $0x388] sm:$0xff]  ;;  %v172_v14 = vld [vmem:[%s1351_s0 + $0x410] sm:$0xff]  ;;  %v174_v15 = vld [vmem:[%s1351_s0 + $0x420] sm:$0xff]  ;;  %v268_v21 = vrot.slane %v267_v61, 1  ;;  %v286_v22 = vadd.f32 %v285_v62, %v284_v42 }
  0x25   :  { %v158_v18 = vld [vmem:[%s1351_s0 + $0x3a0] sm:$0xff]  ;;  %v173_v19 = vld [vmem:[%s1351_s0 + $0x418] sm:$0xff]  ;;  %v175_v20 = vld [vmem:[%s1351_s0 + $0x428] sm:$0xff]  ;;  %v338_v23 = vsel %vm261_vm0, %v118_v1, 0.0  ;;  %v357_v28 = vsel %vm261_vm0, %v119_v2, 0.0  ;;  %v390_v29 = vadd.f32 %v389_v4, %v135_v7  ;;  %v424_v31 = vadd.f32 %v423_v6, %v153_v8 }
  0x26   :  { %v406_v17 = vadd.f32 %v405_v5, %v154_v60  ;;  %v372_v24 = vadd.f32 %v371_v63, %v136_v3  ;;  %v137_v25 = vld [vmem:[%s1351_s0 + $0x2f8] sm:$0xff]  ;;  %v138_v26 = vld [vmem:[%s1351_s0 + $0x300] sm:$0xff]  ;;  %v176_v27 = vld [vmem:[%s1351_s0 + $0x430] sm:$0xff]  ;;  %v304_v35 = vrot.slane %v303_v10, 2  ;;  %v322_v36 = vadd.f32 %v321_v11, %v320_v47 }
  0x27   :  { %v157_v32 = vld [vmem:[%s1351_s0 + $0x398] sm:$0xff]  ;;  %v160_v33 = vld [vmem:[%s1351_s0 + $0x3b0] sm:$0xff]  ;;  %v356_v37 = vadd.f32 %v355_v12, %v117_v0  ;;  %v441_v38 = vadd.f32 %v174_v15, %v172_v14  ;;  %v178_v40 = vld [vmem:[%s1351_s0 + $0x440] sm:$0xff]  ;;  %v339_v41 = vadd.f32 %v338_v23, %v337_v16  ;;  %v425_v43 = vadd.f32 %v424_v31, %v155_v13 }
  0x28   :  { %v407_v30 = vadd.f32 %v406_v17, %v156_v9  ;;  %v177_v34 = vld [vmem:[%s1351_s0 + $0x438] sm:$0xff]  ;;  %v144_v39 = vld [vmem:[%s1351_s0 + $0x330] sm:$0xf]  ;;  %v460_v44 = vadd.f32 %v175_v20, %v173_v19  ;;  %v139_v45 = vld [vmem:[%s1351_s0 + $0x308] sm:$0xff]  ;;  %v1033_v48 = vadd.f32 %v268_v21, %v267_v61  ;;  %v287_v49 = vrot.slane %v286_v22, 1 }
  0x29   :  { %v159_v46 = vld [vmem:[%s1351_s0 + $0x3a8] sm:$0xff]  ;;  %v162_v47 = vld [vmem:[%s1351_s0 + $0x3c0] sm:$0xff]  ;;  %v373_v50 = vadd.f32 %v372_v24, %v138_v26  ;;  %v442_v51 = vadd.f32 %v441_v38, %v176_v27  ;;  %v140_v52 = vld [vmem:[%s1351_s0 + $0x310] sm:$0xff]  ;;  %v391_v55 = vadd.f32 %v390_v29, %v137_v25  ;;  %v426_v57 = vadd.f32 %v425_v43, %v157_v32 }
  0x2a   :  { %v408_v42 = vadd.f32 %v407_v30, %v158_v18  ;;  %v145_v53 = vld [vmem:[%s1351_s0 + $0x338] sm:$0xf]  ;;  %v180_v54 = vld [vmem:[%s1351_s0 + $0x450] sm:$0xff]  ;;  %v461_v58 = vadd.f32 %v460_v44, %v177_v34  ;;  %v179_v61 = vld [vmem:[%s1351_s0 + $0x448] sm:$0xff]  ;;  %v1053_v62 = vadd.f32 %v304_v35, %v303_v10  ;;  %v323_v63 = vrot.slane %v322_v36, 2 }
  0x2b   :  { %v161_v59 = vld [vmem:[%s1351_s0 + $0x3b8] sm:$0xff]  ;;  %v164_v60 = vld [vmem:[%s1351_s0 + $0x3d0] sm:$0xff]  ;;  %v1056_v0 = vsel %vm261_vm0, %v144_v39, 0.0  ;;  %v443_v1 = vadd.f32 %v442_v51, %v178_v40  ;;  %v142_v2 = vld [vmem:[%s1351_s0 + $0x320] sm:$0xff]  ;;  %v340_v6 = vrot.slane %v339_v41, 4  ;;  %v358_v7 = vadd.f32 %v357_v28, %v356_v37 }
  0x2c   :  { %v409_v56 = vadd.f32 %v408_v42, %v160_v33  ;;  %v182_v3 = vld [vmem:[%s1351_s0 + $0x460] sm:$0xff]  ;;  %v200_v5 = vld [vmem:[%s1351_s0 + $0x4f0] sm:$0xff]  ;;  %v427_v9 = vadd.f32 %v426_v57, %v159_v46  ;;  %v141_v10 = vld [vmem:[%s1351_s0 + $0x318] sm:$0xff]  ;;  %v1082_v14 = vadd.f32 %v287_v49, %v286_v22  ;;  %v374_v15 = vadd.f32 %v373_v50, %v140_v52 }
  0x2d   :  { %v198_v4 = vld [vmem:[%s1351_s0 + $0x4e0] sm:$0xff]  ;;  %v163_v11 = vld [vmem:[%s1351_s0 + $0x3c8] sm:$0xff]  ;;  %v181_v12 = vld [vmem:[%s1351_s0 + $0x458] sm:$0xff]  ;;  %v1085_v16 = vsel %vm261_vm0, %v145_v53, 0.0  ;;  %v444_v17 = vadd.f32 %v443_v1, %v180_v54  ;;  %v392_v21 = vadd.f32 %v391_v55, %v139_v45  ;;  %v462_v24 = vadd.f32 %v461_v58, %v179_v61 }
  0x2e   :  { %v410_v8 = vadd.f32 %v409_v56, %v162_v47  ;;  %v184_v13 = vld [vmem:[%s1351_s0 + $0x470] sm:$0xff]  ;;  %v199_v18 = vld [vmem:[%s1351_s0 + $0x4e8] sm:$0xff]  ;;  %v201_v19 = vld [vmem:[%s1351_s0 + $0x4f8] sm:$0xff]  ;;  %v428_v23 = vadd.f32 %v427_v9, %v161_v59  ;;  %v306_v28 = vrot.slane %v1053_v62, 1  ;;  %v1106_v29 = vadd.f32 %v323_v63, %v322_v36 }
  0x2f   :  { %v202_v20 = vld [vmem:[%s1351_s0 + $0x500] sm:$0xff]  ;;  %v165_v25 = vld [vmem:[%s1351_s0 + $0x3d8] sm:$0xff]  ;;  %v183_v27 = vld [vmem:[%s1351_s0 + $0x468] sm:$0xff]  ;;  %v445_v30 = vadd.f32 %v444_v17, %v182_v3  ;;  %v479_v31 = vadd.f32 %v200_v5, %v198_v4  ;;  %v341_v35 = vadd.f32 %v340_v6, %v339_v41  ;;  %v359_v37 = vrot.slane %v358_v7, 4 }
  0x30   :  { %v411_v22 = vadd.f32 %v410_v8, %v164_v60  ;;  %v166_v26 = vld [vmem:[%s1351_s0 + $0x3e0] sm:$0xff]  ;;  %v203_v33 = vld [vmem:[%s1351_s0 + $0x508] sm:$0xff]  ;;  %v204_v34 = vld [vmem:[%s1351_s0 + $0x510] sm:$0xff]  ;;  %v429_v38 = vadd.f32 %v428_v23, %v163_v11  ;;  %v463_v39 = vadd.f32 %v462_v24, %v181_v12  ;;  %v375_v41 = vadd.f32 %v374_v15, %v142_v2 }
  0x31   :  { %v186_v32 = vld [vmem:[%s1351_s0 + $0x480] sm:$0xff]  ;;  %v143_v36 = vld [vmem:[%s1351_s0 + $0x328] sm:$0xff]  ;;  %v168_v42 = vld [vmem:[%s1351_s0 + $0x3f0] sm:$0xff]  ;;  %v446_v44 = vadd.f32 %v445_v30, %v184_v13  ;;  %v480_v45 = vadd.f32 %v479_v31, %v202_v20  ;;  %v498_v46 = vadd.f32 %v201_v19, %v199_v18  ;;  %v393_v51 = vadd.f32 %v392_v21, %v141_v10 }
  0x32   :  { %v167_v40 = vld [vmem:[%s1351_s0 + $0x3e8] sm:$0xff]  ;;  %v185_v43 = vld [vmem:[%s1351_s0 + $0x478] sm:$0xff]  ;;  %v170_v47 = vld [vmem:[%s1351_s0 + $0x400] sm:$0xf]  ;;  %v412_v52 = vadd.f32 %v411_v22, %v166_v26  ;;  %v430_v53 = vadd.f32 %v429_v38, %v165_v25  ;;  %v464_v54 = vadd.f32 %v463_v39, %v183_v27  ;;  %v325_v58 = vrot.slane %v1106_v29, 1 }
  0x33   :  { %v188_v49 = vld [vmem:[%s1351_s0 + $0x490] sm:$0xff]  ;;  %v206_v50 = vld [vmem:[%s1351_s0 + $0x520] sm:$0xff]  ;;  %v169_v55 = vld [vmem:[%s1351_s0 + $0x3f8] sm:$0xff]  ;;  %v447_v59 = vadd.f32 %v446_v44, %v186_v32  ;;  %v481_v60 = vadd.f32 %v480_v45, %v204_v34  ;;  %v499_v61 = vadd.f32 %v498_v46, %v203_v33  ;;  %v342_v3 = vrot.slane %v341_v35, 2 }
  0x34   :  { %v171_v56 = vld [vmem:[%s1351_s0 + $0x408] sm:$0xf]  ;;  %v190_v63 = vld [vmem:[%s1351_s0 + $0x4a0] sm:$0xff]  ;;  %v205_v1 = vld [vmem:[%s1351_s0 + $0x518] sm:$0xff]  ;;  %v1157_v4 = vadd.f32 %v359_v37, %v358_v7  ;;  %v431_v5 = vadd.f32 %v430_v53, %v167_v40  ;;  %v465_v6 = vadd.f32 %v464_v54, %v185_v43  ;;  %v1169_v11 = vadd.f32 %v306_v28, %v1053_v62 }
  0x35   :  { %v187_v57 = vld [vmem:[%s1351_s0 + $0x488] sm:$0xff]  ;;  %v208_v2 = vld [vmem:[%s1351_s0 + $0x530] sm:$0xff]  ;;  %v189_v8 = vld [vmem:[%s1351_s0 + $0x498] sm:$0xff]  ;;  %v414_v7 = vsel %vm261_vm0, %v170_v47, 0.0  ;;  %v448_v12 = vadd.f32 %v447_v59, %v188_v49  ;;  %v482_v13 = vadd.f32 %v481_v60, %v206_v50  ;;  %v377_v19 = vadd.f32 %v1056_v0, %v375_v41 }
  0x36   :  { %v191_v9 = vld [vmem:[%s1351_s0 + $0x4a8] sm:$0xff]  ;;  %v192_v10 = vld [vmem:[%s1351_s0 + $0x4b0] sm:$0xff]  ;;  %v210_v18 = vld [vmem:[%s1351_s0 + $0x540] sm:$0xff]  ;;  %v394_v62 = vadd.f32 %v393_v51, %v143_v36  ;;  %v413_v20 = vadd.f32 %v412_v52, %v168_v42  ;;  %v466_v21 = vadd.f32 %v465_v6, %v187_v57  ;;  %v433_v25 = vsel %vm261_vm0, %v171_v56, 0.0 }
  0x37   :  { %v196_v15 = vld [vmem:[%s1351_s0 + $0x4d0] sm:$0xf]  ;;  %v207_v17 = vld [vmem:[%s1351_s0 + $0x528] sm:$0xff]  ;;  %v193_v22 = vld [vmem:[%s1351_s0 + $0x4b8] sm:$0xff]  ;;  %v449_v26 = vadd.f32 %v448_v12, %v190_v63  ;;  %v483_v27 = vadd.f32 %v482_v13, %v208_v2  ;;  %v500_v0 = vadd.f32 %v499_v61, %v205_v1  ;;  %v1201_v32 = vadd.f32 %v342_v3, %v341_v35 }
  0x38   :  { %v194_v23 = vld [vmem:[%s1351_s0 + $0x4c0] sm:$0xff]  ;;  %v209_v24 = vld [vmem:[%s1351_s0 + $0x538] sm:$0xff]  ;;  %v212_v28 = vld [vmem:[%s1351_s0 + $0x550] sm:$0xff]  ;;  %v361_v33 = vrot.slane %v1157_v4, 2  ;;  %v432_v34 = vadd.f32 %v431_v5, %v169_v55  ;;  %v467_v37 = vadd.f32 %v466_v21, %v189_v8  ;;  %v452_v35 = vsel %vm261_vm0, %v196_v15, 0.0 }
  0x39   :  { %v224_v30 = vld [vmem:[%s1351_s0 + $0x5b0] sm:$0xff]  ;;  %v226_v31 = vld [vmem:[%s1351_s0 + $0x5c0] sm:$0xff]  ;;  %v197_v38 = vld [vmem:[%s1351_s0 + $0x4d8] sm:$0xf]  ;;  %v450_v40 = vadd.f32 %v449_v26, %v192_v10  ;;  %v484_v42 = vadd.f32 %v483_v27, %v210_v18  ;;  %v501_v43 = vadd.f32 %v500_v0, %v207_v17  ;;  %v378_v46 = vrot.slane %v377_v19, 4 }
  0x3a   :  { %v225_v39 = vld [vmem:[%s1351_s0 + $0x5b8] sm:$0xff]  ;;  %v227_v36 = vld [vmem:[%s1351_s0 + $0x5c8] sm:$0xff]  ;;  %v214_v44 = vld [vmem:[%s1351_s0 + $0x560] sm:$0xff]  ;;  %v396_v47 = vadd.f32 %v1085_v16, %v394_v62  ;;  %v415_v49 = vadd.f32 %v414_v7, %v413_v20  ;;  %v468_v50 = vadd.f32 %v467_v37, %v191_v9  ;;  %v517_v55 = vadd.f32 %v226_v31, %v224_v30 }
  0x3b   :  { %v211_v41 = vld [vmem:[%s1351_s0 + $0x548] sm:$0xff]  ;;  %v228_v45 = vld [vmem:[%s1351_s0 + $0x5d0] sm:$0xff]  ;;  %v451_v52 = vadd.f32 %v450_v40, %v194_v23  ;;  %v485_v53 = vadd.f32 %v484_v42, %v212_v28  ;;  %v502_v54 = vadd.f32 %v501_v43, %v209_v24  ;;  %v213_v56 = vld [vmem:[%s1351_s0 + $0x558] sm:$0xff]  ;;  %v434_v59 = vadd.f32 %v433_v25, %v432_v34 }
  0x3c   :  { %v195_v51 = vld [vmem:[%s1351_s0 + $0x4c8] sm:$0xff]  ;;  %v216_v57 = vld [vmem:[%s1351_s0 + $0x570] sm:$0xff]  ;;  %v230_v16 = vld [vmem:[%s1351_s0 + $0x5e0] sm:$0xff]  ;;  %v469_v60 = vadd.f32 %v468_v50, %v193_v22  ;;  %v471_v61 = vsel %vm261_vm0, %v197_v38, 0.0  ;;  %v536_v63 = vadd.f32 %v227_v36, %v225_v39  ;;  %v518_v6 = vadd.f32 %v517_v55, %v228_v45 }
  0x3d   :  { %v229_v1 = vld [vmem:[%s1351_s0 + $0x5d8] sm:$0xff]  ;;  %v453_v2 = vadd.f32 %v452_v35, %v451_v52  ;;  %v486_v3 = vadd.f32 %v485_v53, %v214_v44  ;;  %v503_v5 = vadd.f32 %v502_v54, %v211_v41  ;;  %v215_v8 = vld [vmem:[%s1351_s0 + $0x568] sm:$0xff]  ;;  %v218_v9 = vld [vmem:[%s1351_s0 + $0x580] sm:$0xff]  ;;  %v1250_v7 = vadd.f32 %v361_v33, %v1157_v4 }
  0x3e   :  { %v232_v10 = vld [vmem:[%s1351_s0 + $0x5f0] sm:$0xff]  ;;  %v397_v12 = vrot.slane %v396_v47, 4  ;;  %v416_v13 = vrot.slane %v415_v49, 4  ;;  %v470_v15 = vadd.f32 %v469_v60, %v195_v51  ;;  %v222_v17 = vld [vmem:[%s1351_s0 + $0x5a0] sm:$0xf]  ;;  %v231_v18 = vld [vmem:[%s1351_s0 + $0x5e8] sm:$0xff]  ;;  %v379_v62 = vadd.f32 %v378_v46, %v377_v19 }
  0x3f   :  { %v487_v20 = vadd.f32 %v486_v3, %v216_v57  ;;  %v504_v21 = vadd.f32 %v503_v5, %v213_v56  ;;  %v519_v22 = vadd.f32 %v518_v6, %v230_v16  ;;  %v217_v4 = vld [vmem:[%s1351_s0 + $0x578] sm:$0xff]  ;;  %v220_v23 = vld [vmem:[%s1351_s0 + $0x590] sm:$0xff]  ;;  %v234_v24 = vld [vmem:[%s1351_s0 + $0x600] sm:$0xff]  ;;  %v344_v25 = vrot.slane %v1201_v32, 1 }
  0x40   :  { %v435_v26 = vrot.slane %v434_v59, 4  ;;  %v472_v27 = vadd.f32 %v471_v61, %v470_v15  ;;  %v537_v19 = vadd.f32 %v536_v63, %v229_v1  ;;  %v233_v0 = vld [vmem:[%s1351_s0 + $0x5f8] sm:$0xff]  ;;  %v454_v28 = vrot.slane %v453_v2, 4  ;;  %v219_v34 = vld [vmem:[%s1351_s0 + $0x588] sm:$0xff]  ;;  %v236_v37 = vld [vmem:[%s1351_s0 + $0x610] sm:$0xff] }
  0x41   :  { %v488_v30 = vadd.f32 %v487_v20, %v218_v9  ;;  %v505_v31 = vadd.f32 %v504_v21, %v215_v8  ;;  %v520_v33 = vadd.f32 %v519_v22, %v232_v10  ;;  %v398_v38 = vadd.f32 %v397_v12, %v396_v47  ;;  %v223_v35 = vld [vmem:[%s1351_s0 + $0x5a8] sm:$0xf]  ;;  %v221_v46 = vld [vmem:[%s1351_s0 + $0x598] sm:$0xff]  ;;  %v238_v47 = vld [vmem:[%s1351_s0 + $0x620] sm:$0xff] }
  0x42   :  { %v417_v39 = vadd.f32 %v416_v13, %v415_v49  ;;  %v490_v36 = vsel %vm261_vm0, %v222_v17, 0.0  ;;  %v538_v40 = vadd.f32 %v537_v19, %v231_v18  ;;  %v235_v42 = vld [vmem:[%s1351_s0 + $0x608] sm:$0xff]  ;;  %v380_v43 = vrot.slane %v379_v62, 2  ;;  %v237_v53 = vld [vmem:[%s1351_s0 + $0x618] sm:$0xff]  ;;  %v240_v16 = vld [vmem:[%s1351_s0 + $0x630] sm:$0xff] }
  0x43   :  { %v489_v41 = vadd.f32 %v488_v30, %v220_v23  ;;  %v506_v44 = vadd.f32 %v505_v31, %v217_v4  ;;  %v521_v45 = vadd.f32 %v520_v33, %v234_v24  ;;  %v363_v49 = vrot.slane %v1250_v7, 1  ;;  %v239_v1 = vld [vmem:[%s1351_s0 + $0x628] sm:$0xff]  ;;  %v242_v8 = vld [vmem:[%s1351_s0 + $0x640] sm:$0xff]  ;;  %v241_v15 = vld [vmem:[%s1351_s0 + $0x638] sm:$0xff] }
  0x44   :  { %v436_v50 = vadd.f32 %v435_v26, %v434_v59  ;;  %v473_v51 = vrot.slane %v472_v27, 4  ;;  %v539_v52 = vadd.f32 %v538_v40, %v233_v0  ;;  %v455_v54 = vadd.f32 %v454_v28, %v453_v2  ;;  %v244_v21 = vld [vmem:[%s1351_s0 + $0x650] sm:$0xff]  ;;  %v243_v23 = vld [vmem:[%s1351_s0 + $0x648] sm:$0xff]  ;;  %v245_v33 = vld [vmem:[%s1351_s0 + $0x658] sm:$0xff] }
  0x45   :  { %v491_v55 = vadd.f32 %v490_v36, %v489_v41  ;;  %v507_v56 = vadd.f32 %v506_v44, %v219_v34  ;;  %v522_v57 = vadd.f32 %v521_v45, %v236_v37  ;;  %v399_v60 = vrot.slane %v398_v38, 2  ;;  %v248_v24 = vld [vmem:[%s1351_s0 + $0x670] sm:$0xf] }
  0x46   :  { %v418_v61 = vrot.slane %v417_v39, 2  ;;  %v509_v63 = vsel %vm261_vm0, %v223_v35, 0.0  ;;  %v540_v59 = vadd.f32 %v539_v52, %v235_v42  ;;  %v381_v3 = vadd.f32 %v380_v43, %v379_v62 }
  0x47   :  { %v492_v5 = vrot.slane %v491_v55, 4  ;;  %v508_v6 = vadd.f32 %v507_v56, %v221_v46  ;;  %v523_v2 = vadd.f32 %v522_v57, %v238_v47  ;;  %v326_v9 = vadd.f32 %v325_v58, %v1106_v29 }
  0x48   :  { %v437_v10 = vrot.slane %v436_v50, 2  ;;  %v474_v12 = vadd.f32 %v473_v51, %v472_v27  ;;  %v541_v13 = vadd.f32 %v540_v59, %v237_v53  ;;  %v456_v17 = vrot.slane %v455_v54, 2 }
  0x49   :  { %v493_v18 = vadd.f32 %v492_v5, %v491_v55  ;;  %v510_v62 = vadd.f32 %v509_v63, %v508_v6  ;;  %v524_v20 = vadd.f32 %v523_v2, %v240_v16  ;;  %v345_v22 = vadd.f32 %v344_v25, %v1201_v32  ;;  %v246_v32 = vld [vmem:[%s1351_s0 + $0x660] sm:$0xff] }
  0x4a   :  { %v400_v4 = vadd.f32 %v399_v60, %v398_v38  ;;  %v419_v29 = vadd.f32 %v418_v61, %v417_v39  ;;  %v542_v58 = vadd.f32 %v541_v13, %v239_v1  ;;  %v364_v26 = vadd.f32 %v363_v49, %v1250_v7  ;;  %v249_v39 = vld [vmem:[%s1351_s0 + $0x678] sm:$0xf] }
  0x4b   :  { %v382_v27 = vrot.slane %v381_v3, 1  ;;  %v511_v19 = vrot.slane %v510_v62, 4  ;;  %v525_v0 = vadd.f32 %v524_v20, %v242_v8  ;;  %v475_v25 = vrot.slane %v474_v12, 2 }
  0x4c   :  { %v494_v28 = vrot.slane %v493_v18, 2  ;;  %v543_v30 = vadd.f32 %v542_v58, %v241_v15  ;;  %v572_v31 = vsel %vm571_vm1, %v1169_v11, %v1033_v48  ;;  %v438_v34 = vadd.f32 %v437_v10, %v436_v50  ;;  %v247_v48 = vld [vmem:[%s1351_s0 + $0x668] sm:$0xff]  ;;  %s650_s0 = smov [#allocation3]  }
  0x4d   :  { %v457_v7 = vadd.f32 %v456_v17, %v455_v54  ;;  %v512_v37 = vadd.f32 %v511_v19, %v510_v62  ;;  %v526_v38 = vadd.f32 %v525_v0, %v244_v21  ;;  %v401_v36 = vrot.slane %v400_v4, 1  ;;  %s613_s16 = sshll.u32 %s650_s0, 4  ;;  %s614_s16 = int_to_ptr.vmem [resolvable:$true] %s613_s16 }
  0x4e   :  { %v420_v40 = vrot.slane %v419_v29, 1  ;;  %v528_v35 = vsel %vm261_vm0, %v248_v24, 0.0  ;;  %v544_v42 = vadd.f32 %v543_v30, %v243_v23  ;;  %v383_v11 = vadd.f32 %v382_v27, %v381_v3  ;;  %s628_s17 = scalar_lea.vmem %s614_s16, 256  ;;  %p633_p1 = scmp.lt.s32.totalorder %s614_s16, %s614_s16 }
  0x4f   :  { %v513_v43 = vrot.slane %v512_v37, 2  ;;  %v527_v41 = vadd.f32 %v526_v38, %v246_v32  ;;  %v574_v44 = vsel %vm573_vm2, %v345_v22, %v572_v31  ;;  %v476_v45 = vadd.f32 %v475_v25, %v474_v12  ;;  %p629_p0 = scmp.ne.s32.totalorder %s614_s16, %s628_s17  ;;  %p634_p2 = scmp.lt.s32.totalorder %s628_s17, %s628_s17 }
  0x50   :  { %v495_v46 = vadd.f32 %v494_v28, %v493_v18  ;;  %v545_v47 = vadd.f32 %v544_v42, %v245_v33  ;;  %v585_v49 = vsel %vm571_vm1, %v326_v9, %v1082_v14  ;;  %v439_v50 = vrot.slane %v438_v34, 1 }
  0x51   :  { %v458_v51 = vrot.slane %v457_v7, 1  ;;  %v529_v52 = vadd.f32 %v528_v35, %v527_v41  ;;  %v547_v53 = vsel %vm261_vm0, %v249_v39, 0.0  ;;  %v402_v54 = vadd.f32 %v401_v36, %v400_v4  ;;  %p635_p3 = por %p634_p2, %p633_p1 }
  0x52   :  { %v421_v55 = vadd.f32 %v420_v40, %v419_v29  ;;  %v546_v56 = vadd.f32 %v545_v47, %v247_v48  ;;  %v514_v57 = vadd.f32 %v513_v43, %v512_v37  ;;  %v576_v60 = vsel %vm575_vm3, %v383_v11, %v574_v44 }
  0x53   :  { %v530_v16 = vrot.slane %v529_v52, 4  ;;  %v586_v61 = vsel %vm573_vm2, %v364_v26, %v585_v49  ;;  %v477_v63 = vrot.slane %v476_v45, 1  ;;  %v496_v59 = vrot.slane %v495_v46, 1  ;;  %p636_p4 = pnand %p635_p3, %p629_p0 }
  0x54   :  { %v548_v1 = vadd.f32 %v547_v53, %v546_v56  ;;  %v440_v3 = vadd.f32 %v439_v50, %v438_v34  ;;  %v459_v14 = vadd.f32 %v458_v51, %v457_v7  ;;  %v578_v2 = vsel %vm577_vm4, %v421_v55, %v576_v60 }
  0x55   :  { %v531_v5 = vadd.f32 %v530_v16, %v529_v52  ;;  %v587_v8 = vsel %vm575_vm3, %v402_v54, %v586_v61  ;;  %v515_v9 = vrot.slane %v514_v57, 1  ;;  %v478_v12 = vadd.f32 %v477_v63, %v476_v45 }
  0x56   :  { %v549_v6 = vrot.slane %v548_v1, 4  ;;  %v497_v13 = vadd.f32 %v496_v59, %v495_v46  ;;  %v580_v18 = vsel %vm579_vm5, %v459_v14, %v578_v2  ;;  %v588_v62 = vsel %vm577_vm4, %v440_v3, %v587_v8 }
  0x57   :  { %v532_v10 = vrot.slane %v531_v5, 2  ;;  %v516_v21 = vadd.f32 %v515_v9, %v514_v57  ;;  %v589_v58 = vsel %vm579_vm5, %v478_v12, %v588_v62 }
  0x58   :  { %v550_v15 = vadd.f32 %v549_v6, %v548_v1  ;;  %v582_v29 = vsel %vm581_vm6, %v497_v13, %v580_v18 }
  0x59   :  { %v533_v17 = vadd.f32 %v532_v10, %v531_v5  ;;  %v590_v27 = vsel %vm581_vm6, %v516_v21, %v589_v58 }
  0x5a   :  { %v551_v20 = vrot.slane %v550_v15, 2 }
  0x5b   :  { %v534_v22 = vrot.slane %v533_v17, 1 }
  0x5c   :  { %v552_v4 = vadd.f32 %v551_v20, %v550_v15 }
  0x5d   :  { %v535_v23 = vadd.f32 %v534_v22, %v533_v17 }
  0x5e   :  { %v553_v24 = vrot.slane %v552_v4, 1 }
  0x5f   :  { %v584_v26 = vsel %vm583_vm7, %v535_v23, %v582_v29 }
  0x60   :  { %v554_v19 = vadd.f32 %v553_v24, %v552_v4  ;;  %v603_v0 = vmul.f32 0.01, %v584_v26 }
  0x62   :  { %v591_v32 = vsel %vm583_vm7, %v554_v19, %v590_v27  ;;  %605 = vst [vmem:[#allocation3] sm:$0xff] %v603_v0 }
  0x63   :  { %v604_v25 = vmul.f32 0.01, %v591_v32 }
  0x65   :  { %606 = vst [vmem:[#allocation3 + $0x8] sm:$0xff] %v604_v25 }
  0x66   :  { %639 = shalt.err (!%p636_p4)
}
  0x67   :  { %616 = dma.vmem_to_hbm [thread:$0]  %s614_s16, 256, %s1352_s1, [#allocation4]  }
  0x68   :  { %648 = dma.done.wait [#allocation4], 256  }
  0x69   :  { %649 = vsyncadd [#allocation4], 4294967040 }
  0x6a   :  { %620 = vsyncpa [#allocation4], 1 }

</bundles_post_ra>
